<compile_context>
chip_gen: v7x
topology: tpu7x:2x2x1
jax: 0.10.0
libtpu: 0.0.40
codegen_flags: <defaults>
</compile_context>

<pallas_src>
import jax
import jax.numpy as jnp
from jax import lax
from jax.experimental import pallas as pl
from jax.experimental.pallas import tpu as pltpu


def fixed_hidden_mlp_kernel(x_ref, wc_ref, bc_ref, w_ref, b_ref, out_ref):
    # x_ref : (B, 20)   input batch
    # wc_ref: (20, 20)  fused weight  W^T @ rand_weight
    # bc_ref: (1, 20)   fused bias    b @ rand_weight + 1
    # w_ref : (20, 20)  Linear weight, transposed to (in, out)
    # b_ref : (1, 20)   Linear bias
    # out_ref: (1, 1)   SMEM scalar result
    x = x_ref[...]

    # X = relu(linear(X) @ rand_weight + 1)   (first Linear pre-fused into wc/bc)
    h = jnp.maximum(
        jnp.dot(x, wc_ref[...], preferred_element_type=jnp.float32) + bc_ref[...],
        0.0,
    )
    # X = linear(X)  (same Linear weights reused)
    y = jnp.dot(h, w_ref[...], preferred_element_type=jnp.float32) + b_ref[...]

    # Merged reduction pass: one sublane reduction over [y | |y|], then two
    # small lane reductions, giving sum(X) and X.abs().sum() together.
    feat = y.shape[1]
    ya = jnp.concatenate([y, jnp.abs(y)], axis=1)      # (B, 2F)
    col = jnp.sum(ya, axis=0, keepdims=True)           # (1, 2F)
    s = jnp.sum(col[:, :feat])                         # sum(X)
    a = jnp.sum(col[:, feat:])                         # X.abs().sum()

    # while X.abs().sum() > 1: X /= 2
    # Halving is exact in fp32, so it folds onto the scalars (s, a). Replace the
    # serial while-loop with an exact branch-free ladder: greedily apply 2^-j
    # for j = 64,32,...,1 whenever a > 2^j, then one final conditional halving.
    # Any finite fp32 a (< 2^128) is fully handled; each applied step is
    # provably necessary and sufficient, so the halving count matches the loop.
    for j in (64, 32, 16, 8, 4, 2, 1):
        hi = 2.0 ** j          # exact fp32 power of two
        lo = 2.0 ** (-j)       # exact fp32 power of two
        f = jnp.where(a > hi, jnp.float32(lo), jnp.float32(1.0))
        a = a * f
        s = s * f
    s = jnp.where(a > 1.0, s * jnp.float32(0.5), s)
    # TODO(synk): if a is +inf the original PyTorch loop never terminates; here
    # the result is simply propagated (inf/nan) instead.

    out_ref[0, 0] = s


def fixed_hidden_mlp(x, linear_w, linear_b, rand_weight):
    """x: (B, 20) f32; linear_w: (20, 20) torch-style (out, in); linear_b: (20,)."""
    B, F = x.shape
    assert F == 20
    f32 = jnp.float32
    if x.dtype != f32:
        x = x.astype(f32)
    if linear_w.dtype != f32:
        linear_w = linear_w.astype(f32)
    if linear_b.dtype != f32:
        linear_b = linear_b.astype(f32)
    if rand_weight.dtype != f32:
        rand_weight = rand_weight.astype(f32)

    w_t = linear_w.T                                   # (in, out): kernel does x @ w_t + b
    b = linear_b.reshape(1, F)
    # Fold first Linear into the fixed random-weight matmul (constant for fixed
    # weights; XLA constant-folds this under jit):
    #   relu((x @ W^T + b) @ R + 1) == relu(x @ (W^T R) + (b R + 1))
    w_c = w_t @ rand_weight                            # (20, 20)
    b_c = (linear_b @ rand_weight + 1.0).reshape(1, F)

    # Note: at B=8 everything (~4 KB) lives in VMEM with no grid. If B grows,
    # add a grid over batch tiles of 256-512 rows with per-tile partial sums
    # finalized under pl.when, and dimension_semantics=("parallel",) so v7x's
    # two TensorCores both participate.
    out = pl.pallas_call(
        fixed_hidden_mlp_kernel,
        out_shape=jax.ShapeDtypeStruct((1, 1), jnp.float32),
        in_specs=[pl.BlockSpec(memory_space=pltpu.MemorySpace.VMEM)] * 5,
        out_specs=pl.BlockSpec(memory_space=pltpu.MemorySpace.SMEM),
    )(x, w_c, b_c, w_t, b)
    return out[0, 0]


if __name__ == "__main__":
    key = jax.random.PRNGKey(0)
    k_x, k_w, k_b, k_rw = jax.random.split(key, 4)

    B = 8
    x = jax.random.normal(k_x, (B, 20), dtype=jnp.float32)

    # Deterministic parameter init (shapes from the module's __init__).
    # nn.Linear(20, 20): weight (20, 20), bias (20,), uniform(-1/sqrt(20), 1/sqrt(20)).
    bound = 1.0 / jnp.sqrt(20.0)
    linear_w = jax.random.uniform(k_w, (20, 20), jnp.float32, -bound, bound)
    linear_b = jax.random.uniform(k_b, (20,), jnp.float32, -bound, bound)
    # torch.rand((20, 20)): uniform [0, 1)
    rand_weight = jax.random.uniform(k_rw, (20, 20), jnp.float32, 0.0, 1.0)

    result = fixed_hidden_mlp(x, linear_w, linear_b, rand_weight)
    jax.block_until_ready(result)

    # Pure-JAX reference following the original (unfused) module math.
    h = x @ linear_w.T + linear_b
    h = jnp.maximum(h @ rand_weight + 1.0, 0.0)
    h = h @ linear_w.T + linear_b
    h = lax.while_loop(lambda c: jnp.sum(jnp.abs(c)) > 1.0, lambda c: c / 2.0, h)
    ref = jnp.sum(h)

    assert jnp.allclose(result, ref, rtol=1e-4, atol=1e-5), (result, ref)
    print("KERNEL_OK")
</pallas_src>

<mosaic_0001>
module attributes {stable_mosaic.version = 11 : i64} {
  func.func @fixed_hidden_mlp_kernel(%arg0: memref<8x20xf32, #tpu.memory_space<vmem>>, %arg1: memref<20x20xf32, #tpu.memory_space<vmem>>, %arg2: memref<1x20xf32, #tpu.memory_space<vmem>>, %arg3: memref<20x20xf32, #tpu.memory_space<vmem>>, %arg4: memref<1x20xf32, #tpu.memory_space<vmem>>, %arg5: memref<1x1xf32, #tpu.memory_space<smem>>) attributes {dimension_semantics = [], scalar_prefetch = 0 : i64, scratch_operands = 0 : i64, tpu.core_type = #tpu.core_type<tc>} {
    %c0 = arith.constant 0 : index
    %c0_0 = arith.constant 0 : index
    %0 = vector.load %arg0[%c0, %c0_0] : memref<8x20xf32, #tpu.memory_space<vmem>>, vector<8x20xf32>
    %c0_1 = arith.constant 0 : index
    %c0_2 = arith.constant 0 : index
    %1 = vector.load %arg1[%c0_1, %c0_2] : memref<20x20xf32, #tpu.memory_space<vmem>>, vector<20x20xf32>
    %cst = arith.constant dense<0.000000e+00> : vector<8x20xf32>
    %2 = tpu.matmul %0, %1, %cst {dimension_numbers = #tpu.dot_dimension_numbers<[1], [0], [0], [1], [0, 0, 1, 1], [], []>} : vector<8x20xf32>, vector<20x20xf32>, vector<8x20xf32> -> vector<8x20xf32>
    %c0_3 = arith.constant 0 : index
    %c0_4 = arith.constant 0 : index
    %3 = vector.load %arg2[%c0_3, %c0_4] : memref<1x20xf32, #tpu.memory_space<vmem>>, vector<1x20xf32>
    %4 = vector.broadcast %3 : vector<1x20xf32> to vector<8x20xf32>
    %5 = arith.addf %2, %4 : vector<8x20xf32>
    %cst_5 = arith.constant 0.000000e+00 : f32
    %6 = vector.broadcast %cst_5 : f32 to vector<8x20xf32>
    %7 = arith.maximumf %5, %6 : vector<8x20xf32>
    %c0_6 = arith.constant 0 : index
    %c0_7 = arith.constant 0 : index
    %8 = vector.load %arg3[%c0_6, %c0_7] : memref<20x20xf32, #tpu.memory_space<vmem>>, vector<20x20xf32>
    %cst_8 = arith.constant dense<0.000000e+00> : vector<8x20xf32>
    %9 = tpu.matmul %7, %8, %cst_8 {dimension_numbers = #tpu.dot_dimension_numbers<[1], [0], [0], [1], [0, 0, 1, 1], [], []>} : vector<8x20xf32>, vector<20x20xf32>, vector<8x20xf32> -> vector<8x20xf32>
    %c0_9 = arith.constant 0 : index
    %c0_10 = arith.constant 0 : index
    %10 = vector.load %arg4[%c0_9, %c0_10] : memref<1x20xf32, #tpu.memory_space<vmem>>, vector<1x20xf32>
    %11 = vector.broadcast %10 : vector<1x20xf32> to vector<8x20xf32>
    %12 = arith.addf %9, %11 : vector<8x20xf32>
    %13 = math.absf %12 : vector<8x20xf32>
    %14 = tpu.concatenate %12, %13 in 1 : vector<8x20xf32>, vector<8x20xf32> -> vector<8x40xf32>
    %cst_11 = arith.constant dense<0.000000e+00> : vector<40xf32>
    %15 = vector.multi_reduction <add>, %14, %cst_11 [0] : vector<8x40xf32> to vector<40xf32>
    %16 = vector.shape_cast %15 : vector<40xf32> to vector<1x40xf32>
    %17 = vector.extract_strided_slice %16 {offsets = [0, 0], sizes = [1, 20], strides = [1, 1]} : vector<1x40xf32> to vector<1x20xf32>
    %18 = vector.shape_cast %17 : vector<1x20xf32> to vector<1x1x20xf32>
    %cst_12 = arith.constant dense<0.000000e+00> : vector<1xf32>
    %19 = vector.multi_reduction <add>, %18, %cst_12 [1, 2] : vector<1x1x20xf32> to vector<1xf32>
    %20 = vector.shape_cast %19 : vector<1xf32> to vector<1x1x1xf32>
    %21 = vector.extract %20[0, 0, 0] : f32 from vector<1x1x1xf32>
    %22 = vector.extract_strided_slice %16 {offsets = [0, 20], sizes = [1, 20], strides = [1, 1]} : vector<1x40xf32> to vector<1x20xf32>
    %23 = vector.shape_cast %22 : vector<1x20xf32> to vector<1x1x20xf32>
    %cst_13 = arith.constant dense<0.000000e+00> : vector<1xf32>
    %24 = vector.multi_reduction <add>, %23, %cst_13 [1, 2] : vector<1x1x20xf32> to vector<1xf32>
    %25 = vector.shape_cast %24 : vector<1xf32> to vector<1x1x1xf32>
    %26 = vector.extract %25[0, 0, 0] : f32 from vector<1x1x1xf32>
    %cst_14 = arith.constant 1.84467441E+19 : f32
    %27 = arith.cmpf ogt, %26, %cst_14 : f32
    %cst_15 = arith.constant 5.42101086E-20 : f32
    %cst_16 = arith.constant 1.000000e+00 : f32
    %28 = arith.select %27, %cst_15, %cst_16 : f32
    %29 = arith.mulf %26, %28 : f32
    %30 = arith.mulf %21, %28 : f32
    %cst_17 = arith.constant 4.2949673E+9 : f32
    %31 = arith.cmpf ogt, %29, %cst_17 : f32
    %cst_18 = arith.constant 2.32830644E-10 : f32
    %cst_19 = arith.constant 1.000000e+00 : f32
    %32 = arith.select %31, %cst_18, %cst_19 : f32
    %33 = arith.mulf %29, %32 : f32
    %34 = arith.mulf %30, %32 : f32
    %cst_20 = arith.constant 6.553600e+04 : f32
    %35 = arith.cmpf ogt, %33, %cst_20 : f32
    %cst_21 = arith.constant 1.52587891E-5 : f32
    %cst_22 = arith.constant 1.000000e+00 : f32
    %36 = arith.select %35, %cst_21, %cst_22 : f32
    %37 = arith.mulf %33, %36 : f32
    %38 = arith.mulf %34, %36 : f32
    %cst_23 = arith.constant 2.560000e+02 : f32
    %39 = arith.cmpf ogt, %37, %cst_23 : f32
    %cst_24 = arith.constant 3.906250e-03 : f32
    %cst_25 = arith.constant 1.000000e+00 : f32
    %40 = arith.select %39, %cst_24, %cst_25 : f32
    %41 = arith.mulf %37, %40 : f32
    %42 = arith.mulf %38, %40 : f32
    %cst_26 = arith.constant 1.600000e+01 : f32
    %43 = arith.cmpf ogt, %41, %cst_26 : f32
    %cst_27 = arith.constant 6.250000e-02 : f32
    %cst_28 = arith.constant 1.000000e+00 : f32
    %44 = arith.select %43, %cst_27, %cst_28 : f32
    %45 = arith.mulf %41, %44 : f32
    %46 = arith.mulf %42, %44 : f32
    %cst_29 = arith.constant 4.000000e+00 : f32
    %47 = arith.cmpf ogt, %45, %cst_29 : f32
    %cst_30 = arith.constant 2.500000e-01 : f32
    %cst_31 = arith.constant 1.000000e+00 : f32
    %48 = arith.select %47, %cst_30, %cst_31 : f32
    %49 = arith.mulf %45, %48 : f32
    %50 = arith.mulf %46, %48 : f32
    %cst_32 = arith.constant 2.000000e+00 : f32
    %51 = arith.cmpf ogt, %49, %cst_32 : f32
    %cst_33 = arith.constant 5.000000e-01 : f32
    %cst_34 = arith.constant 1.000000e+00 : f32
    %52 = arith.select %51, %cst_33, %cst_34 : f32
    %53 = arith.mulf %49, %52 : f32
    %54 = arith.mulf %50, %52 : f32
    %cst_35 = arith.constant 1.000000e+00 : f32
    %55 = arith.cmpf ogt, %53, %cst_35 : f32
    %cst_36 = arith.constant 5.000000e-01 : f32
    %56 = arith.mulf %54, %cst_36 : f32
    %57 = arith.select %55, %56, %54 : f32
    %c0_37 = arith.constant 0 : index
    %c0_38 = arith.constant 0 : index
    %58 = memref.load %arg5[%c0_37, %c0_38] : memref<1x1xf32, #tpu.memory_space<smem>>
    memref.store %57, %arg5[%c0_37, %c0_38] : memref<1x1xf32, #tpu.memory_space<smem>>
    return
  }
}

</mosaic_0001>

<bundles_post_ra>
// kernel: tpu_custom_call.1
= control target key start
LH: loop header
LB: loop body
LE: loop exit
PB: predicated region body
PF: predicated region fallthrough
CT: control target
= control target key end

     0   :  { %10 = vsyncpa [#allocation3], 0  ;;  %s562_s0 = inlined_call_operand.hbm [shape: f32[8,20], index: 0, kind: input, shape index: {}]   ;;  %s563_s1 = inlined_call_operand.hbm [shape: f32[20,20], index: 1, kind: input, shape index: {}]   ;;  %s564_s2 = inlined_call_operand.vmem [shape: f32[1,20], index: 2, kind: input, shape index: {}]   ;;  %s565_s3 = inlined_call_operand.hbm [shape: f32[20,20], index: 3, kind: input, shape index: {}]   ;;  %s566_s4 = inlined_call_operand.vmem [shape: f32[1,20], index: 4, kind: input, shape index: {}]   ;;  %s567_s5 = inlined_call_operand.hbm [shape: f32[1,1], index: 5, kind: output, shape index: {}]  }
   0x1   :  { %11 = vsyncpa [#allocation6], 0 }
   0x2   :  { %12 = vsyncpa [#allocation4], 0  ;;  %s458_s18 = smov [#allocation5]   ;;  %s376_s22 = scalar_lea.hbm %s563_s1, 384 }
   0x3   :  { %s28_s19 = sshll.u32 %s458_s18, 4  ;;  %p377_p0 = scmp.ne.s32.totalorder %s563_s1, %s376_s22  ;;  %s29_s19 = int_to_ptr.vmem [resolvable:$true] %s28_s19 }
   0x4   :  { %p380_p1 = scmp.lt.u32.totalorder %s376_s22, %s563_s1 }
   0x6   :  { %p382_p2 = pnand %p380_p1, %p377_p0 }
   0x8   :  { %385 = shalt.err (!%p382_p2)
}
   0x9   :  { %s386_s27 = scalar_lea.vmem %s29_s19, 384  ;;  %p391_p4 = scmp.lt.s32.totalorder %s29_s19, %s29_s19 }
   0xa   :  { %p387_p3 = scmp.ne.s32.totalorder %s29_s19, %s386_s27  ;;  %p392_p5 = scmp.lt.s32.totalorder %s386_s27, %s386_s27 }
   0xc   :  { %p393_p6 = por %p392_p5, %p391_p4 }
   0xe   :  { %p394_p7 = pnand %p393_p6, %p387_p3 }
  0x10   :  { %397 = shalt.err (!%p394_p7)
}
  0x11   :  { %s459_s28 = smov 128   ;;  %s460_s29 = smov 8  }
  0x12   :  { %34 = dma.hbm_to_vmem [thread:$0]  %s563_s1, 384, %s29_s19, [#allocation6], %s459_s28, %s459_s28, %s460_s29  }
  0x13   :  { %s461_s7 = smov [#allocation2]   ;;  %s462_s9 = smov [#allocation7]  }
  0x14   :  { %s19_s8 = sshll.u32 %s461_s7, 4  ;;  %s42_s10 = sshll.u32 %s462_s9, 4  ;;  %s20_s8 = int_to_ptr.vmem [resolvable:$true] %s19_s8  ;;  %s43_s10 = int_to_ptr.vmem [resolvable:$true] %s42_s10 }
  0x15   :  { %s398_s13 = scalar_lea.hbm %s562_s0, 128 }
  0x16   :  { %p399_p8 = scmp.ne.s32.totalorder %s562_s0, %s398_s13  ;;  %p402_p9 = scmp.lt.u32.totalorder %s398_s13, %s562_s0 }
  0x18   :  { %p404_p10 = pnand %p402_p9, %p399_p8 }
  0x1a   :  { %407 = shalt.err (!%p404_p10)
}
  0x1b   :  { %s408_s1 = scalar_lea.vmem %s20_s8, 128  ;;  %p413_p12 = scmp.lt.s32.totalorder %s20_s8, %s20_s8 }
  0x1c   :  { %p409_p11 = scmp.ne.s32.totalorder %s20_s8, %s408_s1  ;;  %p414_p13 = scmp.lt.s32.totalorder %s408_s1, %s408_s1 }
  0x1e   :  { %p415_p0 = por %p414_p13, %p413_p12 }
  0x20   :  { %p416_p1 = pnand %p415_p0, %p409_p11 }
  0x22   :  { %419 = shalt.err (!%p416_p1)
}
  0x23   :  { %22 = dma.hbm_to_vmem [thread:$0]  %s562_s0, 128, %s20_s8, [#allocation3]  }
  0x24   :  { %s420_s22 = scalar_lea.hbm %s565_s3, 384 }
  0x25   :  { %p421_p2 = scmp.ne.s32.totalorder %s565_s3, %s420_s22  ;;  %p424_p3 = scmp.lt.u32.totalorder %s420_s22, %s565_s3 }
  0x27   :  { %p426_p4 = pnand %p424_p3, %p421_p2 }
  0x29   :  { %429 = shalt.err (!%p426_p4)
}
  0x2a   :  { %s430_s27 = scalar_lea.vmem %s43_s10, 384  ;;  %p435_p6 = scmp.lt.s32.totalorder %s43_s10, %s43_s10 }
  0x2b   :  { %p431_p5 = scmp.ne.s32.totalorder %s43_s10, %s430_s27  ;;  %p436_p7 = scmp.lt.s32.totalorder %s430_s27, %s430_s27 }
  0x2d   :  { %p437_p8 = por %p436_p7, %p435_p6 }
  0x2f   :  { %p438_p9 = pnand %p437_p8, %p431_p5 }
  0x31   :  { %441 = shalt.err (!%p438_p9)
}
  0x32   :  { %48 = dma.hbm_to_vmem [thread:$0]  %s565_s3, 384, %s43_s10, [#allocation6], %s459_s28, %s459_s28, %s460_s29  }
  0x33   :  { %452 = dma.done.wait [#allocation3], 128  }
  0x34   :  { %453 = vsyncadd [#allocation3], 4294967168 }
  0x35   :  { %454 = dma.done.wait [#allocation6], 768  }
  0x36   :  { %455 = vsyncadd [#allocation6], 4294966528  ;;  %v463_v0 = vmov 0.0|0.0   ;;  %vm464_vm0 = vmmov 0   ;;  %v465_v1 = vmov 0.0   ;;  %v61_v2 = vld [vmem:[#allocation5] sm:$0xff] }
  0x37   :  { %355 = vmatprep.subr.bf16.mxu0 %v463_v0  ;;  %343 = vmatprep.mubr.msk.f32.mxu0 %vm464_vm0, %v465_v1  ;;  %v62_v3 = vld [vmem:[#allocation5 + $0x8] sm:$0xff]  ;;  %v63_v5 = vld [vmem:[#allocation5 + $0x10] sm:$0xf]  ;;  %vm75_vm1 = vcmask 1043456   ;;  %v60_v6 = vld [vmem:[#allocation2] sm:$0xff]  ;;  %vm71_vm2 = vcmask 162816  }
  0x38   :  { %358 = vmatprep.subr.bf16.mxu1 %v463_v0  ;;  %352 = vmatprep.mubr.msk.f32.mxu1 %vm464_vm0, %v465_v1  ;;  %v356_v4 = vpack.c.bf16 %v62_v3, %v61_v2  ;;  %v150_v7 = vld [vmem:[#allocation7] sm:$0xff]  ;;  %v151_v8 = vld [vmem:[#allocation7 + $0x8] sm:$0xff]  ;;  %v152_v10 = vld [vmem:[#allocation7 + $0x10] sm:$0xf]  ;;  %s466_s7 = smov 20   ;;  %vm242_vm3 = vcmask 326656  }
  0x39   :  { %v359_v9 = vpack.c.bf16 %v151_v8, %v150_v7  ;;  %v323_v11 = vld [vmem:[%s564_s2] ss:$0 sm:$0xff]  ;;  %vm250_vm4 = vcmask 155648   ;;  %s467_s2 = smov 108   ;;  %s442_s29 = scalar_lea.hbm %s567_s5, 16 }
  0x3a   :  { %357 = vmatpush3.bf16.msra.mxu0 %v356_v4  ;;  %v326_v16 = vld [vmem:[%s566_s4] ss:$0 sm:$0xff]  ;;  %p443_p4 = scmp.ne.s32.totalorder %s567_s5, %s442_s29  ;;  %p446_p5 = scmp.lt.u32.totalorder %s442_s29, %s567_s5 }
  0x3b   :  { %341 = vmatprep.subr.mxu0 %v465_v1  ;;  %360 = vmatpush3.bf16.msra.mxu1 %v359_v9 }
  0x3c   :  { %350 = vmatprep.subr.mxu1 %v465_v1  ;;  %p448_p6 = pnand %p446_p5, %p443_p4 }
  0x3e   :  { %342 = vmatpush3.msk.msra.mxu0 %vm75_vm1, %v63_v5 }
  0x3f   :  { %344 = vmatmul.mubr.msk.f32.vlgmr.msra.gmra.mrb[0].mxu0 %vm71_vm2, %v60_v6  ;;  %351 = vmatpush3.msk.msra.mxu1 %vm75_vm1, %v152_v10 }
 0x112   :  { %v145_v12 = vpop.f32.mrb[0].mxu0 }
 0x113   :  { %v146_v13 = vadd.f32 %v323_v11, %v145_v12  ;;  %v345_v14 = vpop.f32.mrb[1].mxu0 }
 0x115   :  { %v149_v15 = vmax.f32 %v146_v13, 0.0 }
 0x117   :  { %353 = vmatmul.mubr.msk.f32.vlgmr.msra.gmra.mrb[0].mxu1 %vm71_vm2, %v149_v15 }
 0x1ea   :  { %v232_v17 = vpop.f32.mrb[0].mxu1 }
 0x1eb   :  { %v233_v18 = vadd.f32 %v326_v16, %v232_v17  ;;  %v354_v19 = vpop.f32.mrb[1].mxu1 }
 0x1ed   :  { %v236_v20 = vand.u32 2147483647, %v233_v18 }
 0x1ef   :  { %238 = vrot.lane.b32.xlu0 %v236_v20, %s466_s7 }
 0x261   :  { %v239_v21 = vpop.permute.xlu0 %238 }
 0x262   :  { %v241_v22 = vsel %vm71_vm2, %v233_v18, %v239_v21 }
 0x263   :  { %v243_v23 = vsel %vm242_vm3, %v241_v22, 0.0 }
 0x264   :  { %v244_v24 = vrot.slane %v243_v23, 4 }
 0x266   :  { %v245_v25 = vadd.f32 %v244_v24, %v243_v23 }
 0x268   :  { %v246_v26 = vrot.slane %v245_v25, 2 }
 0x26a   :  { %v247_v27 = vadd.f32 %v246_v26, %v245_v25 }
 0x26c   :  { %v248_v28 = vrot.slane %v247_v27, 1 }
 0x26e   :  { %v249_v29 = vadd.f32 %v248_v28, %v247_v27 }
 0x270   :  { %262 = vrot.lane.b32.xlu0 %v249_v29, %s467_s2  ;;  %v251_v30 = vsel %vm250_vm4, %v249_v29, 0.0 }
 0x271   :  { %252 = vadd.xlane.f32.xlu1 %v251_v30 }
 0x2e2   :  { %v263_v31 = vpop.permute.xlu0 %262 }
 0x2e3   :  { %v265_v32 = vsel %vm250_vm4, %v263_v31, 0.0 }
 0x2e4   :  { %266 = vadd.xlane.f32.xlu1 %v265_v32 }
 0x2fe   :  { %v253_v33 = vpop.xlane.xlu1 %252 }
 0x2ff   :  { %v254_v34 = vrot.slane %v253_v33, 4 }
 0x301   :  { %v255_v35 = vadd.f32 %v254_v34, %v253_v33 }
 0x303   :  { %v256_v36 = vrot.slane %v255_v35, 2 }
 0x305   :  { %v257_v37 = vadd.f32 %v256_v36, %v255_v35 }
 0x307   :  { %v258_v38 = vrot.slane %v257_v37, 1 }
 0x309   :  { %v259_v39 = vadd.f32 %v258_v38, %v257_v37 }
 0x30b   :  { %361 = vpush %v259_v39 }
 0x33c   :  { %s362_s4 = spop %361 }
 0x371   :  { %v267_v40 = vpop.xlane.xlu1 %266 }
 0x372   :  { %v268_v41 = vrot.slane %v267_v40, 4 }
 0x374   :  { %v269_v42 = vadd.f32 %v268_v41, %v267_v40 }
 0x376   :  { %v270_v43 = vrot.slane %v269_v42, 2 }
 0x378   :  { %v271_v44 = vadd.f32 %v270_v43, %v269_v42 }
 0x37a   :  { %v272_v45 = vrot.slane %v271_v44, 1 }
 0x37c   :  { %v273_v46 = vadd.f32 %v272_v45, %v271_v44 }
 0x37e   :  { %363 = vpush %v273_v46 }
 0x3af   :  { %s364_s8 = spop %363 }
 0x3b0   :  { %p275_p10 = scmp.gt.f32.partialorder %s364_s8, 1.8446744e+19 }
 0x3b2   :  { %s276_s9 = scalar_select %p275_p10, 5.421011e-20, 1.0 }
 0x3b4   :  { %s277_s10 = smul.f32 %s364_s8, %s276_s9 }
 0x3b5   :  { %s278_s18 = smul.f32 %s362_s4, %s276_s9 }
 0x3b6   :  { %p279_p11 = scmp.gt.f32.partialorder %s277_s10, 4.2949673e+09 }
 0x3b8   :  { %s280_s11 = scalar_select %p279_p11, 2.3283064e-10, 1.0 }
 0x3ba   :  { %s281_s12 = smul.f32 %s280_s11, %s277_s10 }
 0x3bb   :  { %s282_s19 = smul.f32 %s280_s11, %s278_s18 }
 0x3bc   :  { %p283_p12 = scmp.gt.f32.partialorder %s281_s12, 65536.0 }
 0x3be   :  { %s284_s13 = scalar_select %p283_p12, 1.5258789e-05, 1.0 }
 0x3c0   :  { %s285_s14 = smul.f32 %s284_s13, %s281_s12 }
 0x3c1   :  { %s286_s21 = smul.f32 %s284_s13, %s282_s19 }
 0x3c2   :  { %p287_p13 = scmp.gt.f32.partialorder %s285_s14, 256.0 }
 0x3c4   :  { %s288_s15 = scalar_select %p287_p13, 0.00390625, 1.0 }
 0x3c6   :  { %s289_s16 = smul.f32 %s288_s15, %s285_s14 }
 0x3c7   :  { %s290_s23 = smul.f32 %s288_s15, %s286_s21 }
 0x3c8   :  { %p291_p0 = scmp.gt.f32.partialorder %s289_s16, 16.0 }
 0x3ca   :  { %s292_s17 = scalar_select %p291_p0, 0.0625, 1.0 }
 0x3cc   :  { %s293_s1 = smul.f32 %s292_s17, %s289_s16 }
 0x3cd   :  { %s294_s24 = smul.f32 %s292_s17, %s290_s23 }
 0x3ce   :  { %p295_p1 = scmp.gt.f32.partialorder %s293_s1, 4.0 }
 0x3d0   :  { %s296_s20 = scalar_select %p295_p1, 0.25, 1.0 }
 0x3d2   :  { %s297_s22 = smul.f32 %s296_s20, %s293_s1 }
 0x3d3   :  { %s298_s26 = smul.f32 %s296_s20, %s294_s24 }
 0x3d4   :  { %p299_p2 = scmp.gt.f32.partialorder %s297_s22, 2.0 }
 0x3d6   :  { %s300_s25 = scalar_select %p299_p2, 0.5, 1.0 }
 0x3d8   :  { %s301_s27 = smul.f32 %s300_s25, %s297_s22 }
 0x3d9   :  { %s302_s0 = smul.f32 %s300_s25, %s298_s26 }
 0x3da   :  { %p303_p3 = scmp.gt.f32.partialorder %s301_s27, 1.0 }
 0x3db   :  { %s304_s30 = smul.f32 0.5, %s302_s0 }
 0x3dd   :  { %s569_s30 = smov (!%p303_p3, %s304_s30), %s302_s0 }
 0x3de   :  { %307 = sst [smem:[#allocation8]] %s569_s30 }
 0x3df   :  { %451 = shalt.err (!%p448_p6)
}
 0x3e0   :  { %s468_s8 = smov [#allocation8]  }
 0x3e1   :  { %315 = dma.smem_to_hbm %s468_s8, 16, %s567_s5, [#allocation4]  }
 0x3e2   :  { %456 = dma.done.wait [#allocation4], 16  }
 0x3e3   :  { %457 = vsyncadd [#allocation4], 4294967280 }
 0x3e4   :  { %319 = sfence }
 0x3e5   :  { %320 = vsyncpa [#allocation3], 1 }
 0x3e6   :  { %321 = vsyncpa [#allocation6], 1 }
 0x3e7   :  { %322 = vsyncpa [#allocation4], 1 }

</bundles_post_ra>
